<compile_context>
chip_gen: v7x
topology: tpu7x:2x2x1
jax: 0.10.0
libtpu: 0.0.40
codegen_flags: <defaults>
</compile_context>

<pallas_src>
import functools

import numpy as np
import jax
import jax.numpy as jnp
from jax.experimental import pallas as pl
from jax.experimental.pallas import tpu as pltpu


# ---------------------------------------------------------------------------
# Schedule construction (host-side numpy "parameter init", same math as torch)
# ---------------------------------------------------------------------------
def cosine_beta_schedule(timesteps, s=0.004, raise_to_power: float = 1):
    steps = timesteps + 2
    x = np.linspace(0, steps, steps)
    alphas_cumprod = np.cos((x / steps + s) / (1 + s) * np.pi * 0.5) ** 2
    alphas_cumprod = alphas_cumprod / alphas_cumprod[0]
    betas = 1 - alphas_cumprod[1:] / alphas_cumprod[:-1]
    betas = np.clip(betas, a_min=0, a_max=0.999)
    alphas = 1.0 - betas
    alphas_cumprod = np.cumprod(alphas, axis=0)
    if raise_to_power != 1:
        alphas_cumprod = np.power(alphas_cumprod, raise_to_power)
    return alphas_cumprod


def clip_noise_schedule(alphas2, clip_value=0.001):
    alphas2 = np.concatenate([np.ones(1), alphas2], axis=0)
    alphas_step = alphas2[1:] / alphas2[:-1]
    alphas_step = np.clip(alphas_step, a_min=clip_value, a_max=1.0)
    alphas2 = np.cumprod(alphas_step, axis=0)
    return alphas2


def polynomial_schedule(timesteps: int, s=0.0001, power=3.0):
    steps = timesteps + 1
    x = np.linspace(0, steps, steps)
    alphas2 = (1 - np.power(x / steps, power)) ** 2
    alphas2 = clip_noise_schedule(alphas2, clip_value=0.001)
    precision = 1 - 2 * s
    alphas2 = precision * alphas2 + s
    return alphas2


def build_gamma_table(noise_schedule: str, timesteps: int, precision: float,
                      task_type=None) -> np.ndarray:
    # The task_type == 'scaffold' branch in the reference performs identical math.
    if noise_schedule == 'cosine':
        alphas2 = cosine_beta_schedule(timesteps)
    elif 'polynomial' in noise_schedule:
        splits = noise_schedule.split('_')
        assert len(splits) == 2
        power = float(splits[1])
        alphas2 = polynomial_schedule(timesteps, s=precision, power=power)
    else:
        raise ValueError(noise_schedule)
    sigmas2 = 1 - alphas2
    log_alphas2 = np.log(alphas2)
    log_sigmas2 = np.log(sigmas2)
    log_alphas2_to_sigmas2 = log_alphas2 - log_sigmas2
    gamma = (-log_alphas2_to_sigmas2).astype(np.float32)   # (timesteps + 1,)
    return gamma


# ---------------------------------------------------------------------------
# Pallas kernel
#   t_ref:     (1, L)      f32  -- lane-dense chunk of normalized times
#   gamma_ref: (T_pad, 1)  f32  -- gamma table laid out along sublanes (resident)
#   o_ref:     (1, L)      f32  -- lane-dense gathered output
# out[0, c] = gamma[clamp(round(t[0, c] * timesteps), 0, timesteps)]
# ---------------------------------------------------------------------------
def _gamma_lookup_kernel(t_ref, gamma_ref, o_ref, *, timesteps):
    t_pad = gamma_ref.shape[0]
    lanes = t_ref.shape[1]

    t = t_ref[...]                                                   # (1, L)
    # torch.round == round-half-to-even == jnp.round.
    idx = jnp.round(t * jnp.float32(timesteps)).astype(jnp.int32)    # (1, L)
    idx = jnp.clip(idx, 0, timesteps)                                # clamp OOB t

    # Exact one-hot gather along the sublane (table-index) axis: exactly one
    # row matches per lane, all others contribute 0, so the sum is bit-exact.
    sub = jax.lax.broadcasted_iota(jnp.int32, (t_pad, lanes), 0)     # (T_pad, L)
    onehot = sub == idx                                              # (T_pad, L)
    gam = jnp.broadcast_to(gamma_ref[...], (t_pad, lanes))           # lane bcast
    vals = jnp.where(onehot, gam, jnp.float32(0.0))                  # (T_pad, L)
    o_ref[...] = jnp.sum(vals, axis=0, keepdims=True)                # (1, L)


# ---------------------------------------------------------------------------
# Memoized pallas_call builder: one compile per (n_pad, T_pad, timesteps)
# bucket, reused across calls and across schedule instances.
# ---------------------------------------------------------------------------
@functools.lru_cache(maxsize=None)
def _build_lookup_call(n_pad: int, t_pad: int, timesteps: int, lane_block: int):
    kernel = functools.partial(_gamma_lookup_kernel, timesteps=timesteps)

    if n_pad <= lane_block:
        # Small batch: single invocation, no grid, full-array VMEM blocks.
        call = pl.pallas_call(
            kernel,
            out_shape=jax.ShapeDtypeStruct((1, n_pad), jnp.float32),
            in_specs=[
                pl.BlockSpec(memory_space=pltpu.MemorySpace.VMEM),
                pl.BlockSpec(memory_space=pltpu.MemorySpace.VMEM),
            ],
            out_specs=pl.BlockSpec(memory_space=pltpu.MemorySpace.VMEM),
        )
    else:
        # Large batch: 1-D grid over lane blocks; the table stays resident in
        # VMEM (same block index every step); batch axis is parallel (v7x).
        nblk = n_pad // lane_block
        call = pl.pallas_call(
            kernel,
            out_shape=jax.ShapeDtypeStruct((1, n_pad), jnp.float32),
            grid=(nblk,),
            in_specs=[
                pl.BlockSpec((1, lane_block), lambda i: (0, i)),
                pl.BlockSpec((t_pad, 1), lambda i: (0, 0)),
            ],
            out_specs=pl.BlockSpec((1, lane_block), lambda i: (0, i)),
            compiler_params=pltpu.CompilerParams(
                dimension_semantics=("parallel",)),
        )
    return jax.jit(call)


class PredefinedNoiseSchedulePallas:
    """Pallas-backed equivalent of the torch PredefinedNoiseSchedule."""

    LANE_BLOCK = 512  # lanes per grid step; keeps (T_pad, L) temp ~2 MiB (v7x-safe)

    def __init__(self, noise_schedule, timesteps, precision, task_type=None,
                 use_xla_fast_path: bool = False):
        self.timesteps = int(timesteps)
        # float32 round(t * T) matches torch only while T stays well below 2^23.
        assert self.timesteps < (1 << 23), "timesteps too large for f32 rounding"
        self.task_type = task_type
        self.use_xla_fast_path = bool(use_xla_fast_path)

        gamma = build_gamma_table(noise_schedule, timesteps, precision, task_type)
        self.gamma_flat = jnp.asarray(gamma)                  # (T,) for fast path
        T = gamma.shape[0]                                    # timesteps + 1
        T_pad = ((T + 7) // 8) * 8                            # sublane-aligned
        gamma_pad = np.full((T_pad, 1), gamma[-1], dtype=np.float32)
        gamma_pad[:T, 0] = gamma
        self.gamma_col = jnp.asarray(gamma_pad)               # (T_pad, 1)
        self.T_pad = T_pad

    def __call__(self, t):
        t = jnp.asarray(t, jnp.float32)
        orig_shape = t.shape
        n = int(np.prod(orig_shape)) if t.ndim > 0 else 1
        t_flat = t.reshape(n)

        if self.use_xla_fast_path:
            # The whole op is a <=4 KiB table gather; plain XLA avoids the
            # pallas_call custom-call overhead entirely for tiny batches.
            idx = jnp.clip(jnp.round(t_flat * self.timesteps).astype(jnp.int32),
                           0, self.timesteps)
            return jnp.take(self.gamma_flat, idx).reshape(orig_shape)

        # Bucket the padded size (power of two, >=128) so the compiled
        # executable is reused across varying batch sizes.
        n_pad = max(128, int(pl.next_power_of_2(n)))
        t_row = jnp.pad(t_flat, (0, n_pad - n)).reshape(1, n_pad)

        call = _build_lookup_call(n_pad, self.T_pad, self.timesteps,
                                  self.LANE_BLOCK)
        out = call(t_row, self.gamma_col)                     # (1, n_pad)
        # Contiguous slice of the lane-dense row; restore t's shape.
        return out[0, :n].reshape(orig_shape)


if __name__ == "__main__":
    timesteps = 1000
    precision = 1e-4
    sched = PredefinedNoiseSchedulePallas("polynomial_2", timesteps, precision)

    key = jax.random.PRNGKey(0)
    k1, k2 = jax.random.split(key)

    gamma_np = np.asarray(sched.gamma_flat)

    def reference(t_np):
        idx = np.round(t_np * timesteps).astype(np.int64)
        return gamma_np[idx]

    # Small batch -> no-grid single-invocation path (n_pad = 128).
    t_small = jax.random.uniform(k1, (8, 1), dtype=jnp.float32)
    out_small = jax.block_until_ready(sched(t_small))
    np.testing.assert_allclose(np.asarray(out_small),
                               reference(np.asarray(t_small)),
                               rtol=1e-6, atol=1e-6)

    # Larger batch -> gridded path (n_pad = 1024, 2 lane blocks), table resident.
    t_large = jax.random.uniform(k2, (700, 1), dtype=jnp.float32)
    out_large = jax.block_until_ready(sched(t_large))
    np.testing.assert_allclose(np.asarray(out_large),
                               reference(np.asarray(t_large)),
                               rtol=1e-6, atol=1e-6)

    # Second small call with a different n hits the same 128-bucket executable
    # (no recompile) -- exercises the memoized builder.
    t_small2 = jax.random.uniform(k1, (5,), dtype=jnp.float32)
    out_small2 = jax.block_until_ready(sched(t_small2))
    np.testing.assert_allclose(np.asarray(out_small2),
                               reference(np.asarray(t_small2)),
                               rtol=1e-6, atol=1e-6)

    print("KERNEL_OK")
</pallas_src>

<mosaic_0001>
module attributes {stable_mosaic.version = 11 : i64} {
  func.func @_gamma_lookup_kernel(%arg0: memref<1x128xf32, #tpu.memory_space<vmem>>, %arg1: memref<1008x1xf32, #tpu.memory_space<vmem>>, %arg2: memref<1x128xf32, #tpu.memory_space<vmem>>) attributes {dimension_semantics = [], scalar_prefetch = 0 : i64, scratch_operands = 0 : i64, tpu.core_type = #tpu.core_type<tc>} {
    %c0 = arith.constant 0 : index
    %c0_0 = arith.constant 0 : index
    %0 = vector.load %arg0[%c0, %c0_0] : memref<1x128xf32, #tpu.memory_space<vmem>>, vector<1x128xf32>
    %cst = arith.constant 1.000000e+03 : f32
    %1 = vector.broadcast %cst : f32 to vector<1x128xf32>
    %2 = arith.mulf %0, %1 : vector<1x128xf32>
    %3 = math.roundeven %2 : vector<1x128xf32>
    %4 = arith.fptosi %3 : vector<1x128xf32> to vector<1x128xi32>
    %c0_i32 = arith.constant 0 : i32
    %c1000_i32 = arith.constant 1000 : i32
    %5 = vector.broadcast %c0_i32 : i32 to vector<1x128xi32>
    %6 = arith.maxsi %5, %4 : vector<1x128xi32>
    %7 = vector.broadcast %c1000_i32 : i32 to vector<1x128xi32>
    %8 = arith.minsi %7, %6 : vector<1x128xi32>
    %9 = tpu.iota {dimensions = array<i32: 0>} : vector<1008x128xi32>
    %10 = vector.broadcast %8 : vector<1x128xi32> to vector<1008x128xi32>
    %11 = arith.cmpi eq, %9, %10 : vector<1008x128xi32>
    %c0_1 = arith.constant 0 : index
    %c0_2 = arith.constant 0 : index
    %12 = vector.load %arg1[%c0_1, %c0_2] : memref<1008x1xf32, #tpu.memory_space<vmem>>, vector<1008x1xf32>
    %13 = vector.shape_cast %12 : vector<1008x1xf32> to vector<1008x1xf32>
    %14 = vector.broadcast %13 : vector<1008x1xf32> to vector<1008x128xf32>
    %cst_3 = arith.constant 0.000000e+00 : f32
    %15 = vector.broadcast %cst_3 : f32 to vector<1008x128xf32>
    %16 = arith.select %11, %14, %15 : vector<1008x128xi1>, vector<1008x128xf32>
    %cst_4 = arith.constant dense<0.000000e+00> : vector<128xf32>
    %17 = vector.multi_reduction <add>, %16, %cst_4 [0] : vector<1008x128xf32> to vector<128xf32>
    %18 = vector.shape_cast %17 : vector<128xf32> to vector<1x128xf32>
    %c0_5 = arith.constant 0 : index
    %c0_6 = arith.constant 0 : index
    %19 = vector.load %arg2[%c0_5, %c0_6] : memref<1x128xf32, #tpu.memory_space<vmem>>, vector<1x128xf32>
    tpu.vector_store %arg2[%c0_5, %c0_6], %18 {strides = array<i32>} : memref<1x128xf32, #tpu.memory_space<vmem>>, vector<1x128xf32>,
    return
  }
}

</mosaic_0001>

<bundles_post_ra>
// kernel: tpu_custom_call.1
= control target key start
LH: loop header
LB: loop body
LE: loop exit
PB: predicated region body
PF: predicated region fallthrough
CT: control target
= control target key end

     0   :  { %v1335_v2 = vmov 0   ;;  %s2002_s0 = inlined_call_operand.vmem [shape: f32[1,128], index: 0, kind: input, shape index: {}]   ;;  %s2003_s1 = inlined_call_operand.vmem [shape: f32[1008,1], index: 1, kind: input, shape index: {}]   ;;  %s2004_s2 = inlined_call_operand.hbm [shape: f32[1,128], index: 2, kind: output, shape index: {}]  }
   0x1   :  { %v278_v0 = vld [vmem:[%s2003_s1 + $0x10] sm:$0xff]  ;;  %v276_v1 = vld [vmem:[%s2003_s1] sm:$0xff]  ;;  %1310 = vset.pattern.permute.xlu1 %v1335_v2  ;;  %1309 = vset.pattern.permute.xlu0 %v1335_v2  ;;  %v279_v3 = vld [vmem:[%s2003_s1 + $0x18] sm:$0xff] }
   0x2   :  { %414 = vperm.xlu1 %1310, %v278_v0   ;;  %404 = vperm.xlu0 %1309, %v276_v1   ;;  %v277_v4 = vld [vmem:[%s2003_s1 + $0x8] sm:$0xff]  ;;  %v280_v6 = vld [vmem:[%s2003_s1 + $0x20] sm:$0xff]  ;;  %v283_v7 = vld [vmem:[%s2003_s1 + $0x38] sm:$0xff] }
   0x3   :  { %v281_v5 = vld [vmem:[%s2003_s1 + $0x28] sm:$0xff]  ;;  %v282_v8 = vld [vmem:[%s2003_s1 + $0x30] sm:$0xff]  ;;  %v284_v10 = vld [vmem:[%s2003_s1 + $0x40] sm:$0xff] }
   0x4   :  { %v285_v9 = vld [vmem:[%s2003_s1 + $0x48] sm:$0xff]  ;;  %v287_v11 = vld [vmem:[%s2003_s1 + $0x58] sm:$0xff]  ;;  %v286_v12 = vld [vmem:[%s2003_s1 + $0x50] sm:$0xff] }
   0x5   :  { %v289_v13 = vld [vmem:[%s2003_s1 + $0x68] sm:$0xff]  ;;  %v288_v14 = vld [vmem:[%s2003_s1 + $0x60] sm:$0xff] }
   0x6   :  { %419 = vperm.xlu1 %1310, %v279_v3   ;;  %409 = vperm.xlu0 %1309, %v277_v4  }
   0xa   :  { %429 = vperm.xlu1 %1310, %v281_v5   ;;  %424 = vperm.xlu0 %1309, %v280_v6  }
   0xe   :  { %439 = vperm.xlu1 %1310, %v283_v7   ;;  %434 = vperm.xlu0 %1309, %v282_v8  }
  0x12   :  { %449 = vperm.xlu1 %1310, %v285_v9   ;;  %444 = vperm.xlu0 %1309, %v284_v10  }
  0x16   :  { %459 = vperm.xlu1 %1310, %v287_v11   ;;  %454 = vperm.xlu0 %1309, %v286_v12  }
  0x1a   :  { %469 = vperm.xlu1 %1310, %v289_v13   ;;  %464 = vperm.xlu0 %1309, %v288_v14  }
  0x1b   :  { %7 = vsyncpa [#allocation3], 0  ;;  %v291_v15 = vld [vmem:[%s2003_s1 + $0x78] sm:$0xff]  ;;  %v290_v16 = vld [vmem:[%s2003_s1 + $0x70] sm:$0xff]  ;;  %v19_v0 = vlaneseq }
  0x1c   :  { %v293_v17 = vld [vmem:[%s2003_s1 + $0x88] sm:$0xff]  ;;  %v292_v18 = vld [vmem:[%s2003_s1 + $0x80] sm:$0xff]  ;;  %v295_v19 = vld [vmem:[%s2003_s1 + $0x98] sm:$0xff] }
  0x1d   :  { %v294_v20 = vld [vmem:[%s2003_s1 + $0x90] sm:$0xff]  ;;  %v297_v21 = vld [vmem:[%s2003_s1 + $0xa8] sm:$0xff]  ;;  %v296_v22 = vld [vmem:[%s2003_s1 + $0xa0] sm:$0xff]  ;;  %v1541_v4 = vshrl.u32 %v19_v0, 7 }
  0x1e   :  { %479 = vperm.xlu1 %1310, %v291_v15   ;;  %474 = vperm.xlu0 %1309, %v290_v16   ;;  %v299_v23 = vld [vmem:[%s2003_s1 + $0xb8] sm:$0xff]  ;;  %v298_v24 = vld [vmem:[%s2003_s1 + $0xb0] sm:$0xff]  ;;  %v301_v25 = vld [vmem:[%s2003_s1 + $0xc8] sm:$0xff] }
  0x1f   :  { %v300_v26 = vld [vmem:[%s2003_s1 + $0xc0] sm:$0xff]  ;;  %v303_v27 = vld [vmem:[%s2003_s1 + $0xd8] sm:$0xff]  ;;  %v302_v28 = vld [vmem:[%s2003_s1 + $0xd0] sm:$0xff]  ;;  %v148_v7 = vsub.s32 0, %v1541_v4  ;;  %v21_v12 = vadd.s32 8, %v1541_v4  ;;  %v22_v14 = vadd.s32 16, %v1541_v4 }
  0x20   :  { %v305_v29 = vld [vmem:[%s2003_s1 + $0xe8] sm:$0xff]  ;;  %v304_v30 = vld [vmem:[%s2003_s1 + $0xe0] sm:$0xff]  ;;  %v307_v31 = vld [vmem:[%s2003_s1 + $0xf8] sm:$0xff]  ;;  %v23_v16 = vadd.s32 24, %v1541_v4 }
  0x21   :  { %v306_v32 = vld [vmem:[%s2003_s1 + $0xf0] sm:$0xff]  ;;  %v309_v33 = vld [vmem:[%s2003_s1 + $0x108] sm:$0xff]  ;;  %v308_v34 = vld [vmem:[%s2003_s1 + $0x100] sm:$0xff] }
  0x22   :  { %489 = vperm.xlu1 %1310, %v293_v17   ;;  %484 = vperm.xlu0 %1309, %v292_v18   ;;  %v311_v35 = vld [vmem:[%s2003_s1 + $0x118] sm:$0xff]  ;;  %v310_v36 = vld [vmem:[%s2003_s1 + $0x110] sm:$0xff]  ;;  %v313_v37 = vld [vmem:[%s2003_s1 + $0x128] sm:$0xff] }
  0x23   :  { %v312_v38 = vld [vmem:[%s2003_s1 + $0x120] sm:$0xff]  ;;  %v315_v39 = vld [vmem:[%s2003_s1 + $0x138] sm:$0xff]  ;;  %v314_v40 = vld [vmem:[%s2003_s1 + $0x130] sm:$0xff] }
  0x24   :  { %v317_v41 = vld [vmem:[%s2003_s1 + $0x148] sm:$0xff]  ;;  %v316_v42 = vld [vmem:[%s2003_s1 + $0x140] sm:$0xff]  ;;  %v319_v43 = vld [vmem:[%s2003_s1 + $0x158] sm:$0xff] }
  0x25   :  { %v318_v44 = vld [vmem:[%s2003_s1 + $0x150] sm:$0xff]  ;;  %v321_v45 = vld [vmem:[%s2003_s1 + $0x168] sm:$0xff]  ;;  %v320_v46 = vld [vmem:[%s2003_s1 + $0x160] sm:$0xff] }
  0x26   :  { %499 = vperm.xlu1 %1310, %v295_v19   ;;  %494 = vperm.xlu0 %1309, %v294_v20   ;;  %v323_v47 = vld [vmem:[%s2003_s1 + $0x178] sm:$0xff]  ;;  %v322_v48 = vld [vmem:[%s2003_s1 + $0x170] sm:$0xff]  ;;  %v325_v49 = vld [vmem:[%s2003_s1 + $0x188] sm:$0xff] }
  0x27   :  { %v324_v50 = vld [vmem:[%s2003_s1 + $0x180] sm:$0xff]  ;;  %v327_v51 = vld [vmem:[%s2003_s1 + $0x198] sm:$0xff]  ;;  %v326_v52 = vld [vmem:[%s2003_s1 + $0x190] sm:$0xff] }
  0x28   :  { %v329_v53 = vld [vmem:[%s2003_s1 + $0x1a8] sm:$0xff]  ;;  %v328_v54 = vld [vmem:[%s2003_s1 + $0x1a0] sm:$0xff]  ;;  %v331_v56 = vld [vmem:[%s2003_s1 + $0x1b8] sm:$0xff] }
  0x29   :  { %v12_v55 = vld [vmem:[%s2002_s0] sm:$0x1]  ;;  %v330_v57 = vld [vmem:[%s2003_s1 + $0x1b0] sm:$0xff]  ;;  %v333_v59 = vld [vmem:[%s2003_s1 + $0x1c8] sm:$0xff] }
  0x2a   :  { %509 = vperm.xlu1 %1310, %v297_v21   ;;  %504 = vperm.xlu0 %1309, %v296_v22   ;;  %v13_v58 = vmul.f32 1000.0, %v12_v55  ;;  %v332_v60 = vld [vmem:[%s2003_s1 + $0x1c0] sm:$0xff]  ;;  %v335_v62 = vld [vmem:[%s2003_s1 + $0x1d8] sm:$0xff]  ;;  %v334_v63 = vld [vmem:[%s2003_s1 + $0x1d0] sm:$0xff]  ;;  %v24_v21 = vadd.s32 32, %v1541_v4  ;;  %v31_v55 = vadd.s32 88, %v1541_v4 }
  0x2b   :  { %v337_v2 = vld [vmem:[%s2003_s1 + $0x1e8] sm:$0xff]  ;;  %v336_v3 = vld [vmem:[%s2003_s1 + $0x1e0] sm:$0xff]  ;;  %v339_v5 = vld [vmem:[%s2003_s1 + $0x1f8] sm:$0xff] }
  0x2c   :  { %v1306_v61 = vcvt.f32.s32 %v13_v58  ;;  %v338_v6 = vld [vmem:[%s2003_s1 + $0x1f0] sm:$0xff]  ;;  %v341_v10 = vld [vmem:[%s2003_s1 + $0x208] sm:$0xff]  ;;  %v340_v11 = vld [vmem:[%s2003_s1 + $0x200] sm:$0xff] }
  0x2d   :  { %v343_v17 = vld [vmem:[%s2003_s1 + $0x218] sm:$0xff]  ;;  %v342_v18 = vld [vmem:[%s2003_s1 + $0x210] sm:$0xff] }
  0x2e   :  { %519 = vperm.xlu1 %1310, %v299_v23   ;;  %514 = vperm.xlu0 %1309, %v298_v24   ;;  %vm15_vm0 = vcmp.gt.s32.totalorder %v1306_v61, 0 }
  0x2f   :  { %v16_v1 = vsel %vm15_vm0, %v1306_v61, 0 }
  0x30   :  { %vm17_vm1 = vcmp.lt.s32.totalorder %v16_v1, 1000 }
  0x31   :  { %v18_v8 = vsel %vm17_vm1, %v16_v1, 1000  ;;  %v33_v1 = vadd.s32 104, %v1541_v4 }
  0x32   :  { %529 = vperm.xlu1 %1310, %v301_v25   ;;  %524 = vperm.xlu0 %1309, %v300_v26   ;;  %v1550_v9 = vrot.slane %v18_v8, %v148_v7  ;;  %v25_v25 = vadd.s32 40, %v1541_v4  ;;  %v345_v26 = vld [vmem:[%s2003_s1 + $0x228] sm:$0xff] }
  0x34   :  { %vm150_vm2 = vcmp.eq.s32.totalorder %v1541_v4, %v1550_v9  ;;  %vm151_vm3 = vcmp.eq.s32.totalorder %v21_v12, %v1550_v9  ;;  %vm152_vm4 = vcmp.eq.s32.totalorder %v22_v14, %v1550_v9  ;;  %vm153_vm5 = vcmp.eq.s32.totalorder %v23_v16, %v1550_v9  ;;  %v355_v14 = vld [vmem:[%s2003_s1 + $0x278] sm:$0xff] }
  0x35   :  { %vm154_vm6 = vcmp.eq.s32.totalorder %v24_v21, %v1550_v9  ;;  %vm155_vm7 = vcmp.eq.s32.totalorder %v25_v25, %v1550_v9  ;;  %vm161_vm13 = vcmp.eq.s32.totalorder %v31_v55, %v1550_v9  ;;  %vm163_vm15 = vcmp.eq.s32.totalorder %v33_v1, %v1550_v9  ;;  %v356_v25 = vld [vmem:[%s2003_s1 + $0x280] sm:$0xff]  ;;  %v362_v55 = vld [vmem:[%s2003_s1 + $0x2b0] sm:$0xff] }
  0x36   :  { %539 = vperm.xlu1 %1310, %v303_v27   ;;  %534 = vperm.xlu0 %1309, %v302_v28   ;;  %v344_v27 = vld [vmem:[%s2003_s1 + $0x220] sm:$0xff] }
  0x37   :  { %v364_v1 = vld [vmem:[%s2003_s1 + $0x2c0] sm:$0xff] }
  0x3a   :  { %549 = vperm.xlu1 %1310, %v305_v29   ;;  %544 = vperm.xlu0 %1309, %v304_v30  }
  0x3e   :  { %559 = vperm.xlu1 %1310, %v307_v31   ;;  %554 = vperm.xlu0 %1309, %v306_v32   ;;  %v26_v32 = vadd.s32 48, %v1541_v4 }
  0x40   :  { %vm156_vm8 = vcmp.eq.s32.totalorder %v26_v32, %v1550_v9 }
  0x42   :  { %569 = vperm.xlu1 %1310, %v309_v33   ;;  %564 = vperm.xlu0 %1309, %v308_v34  }
  0x46   :  { %579 = vperm.xlu1 %1310, %v311_v35   ;;  %574 = vperm.xlu0 %1309, %v310_v36   ;;  %v27_v35 = vadd.s32 56, %v1541_v4  ;;  %v347_v36 = vld [vmem:[%s2003_s1 + $0x238] sm:$0xff] }
  0x48   :  { %vm157_vm9 = vcmp.eq.s32.totalorder %v27_v35, %v1550_v9  ;;  %v358_v35 = vld [vmem:[%s2003_s1 + $0x290] sm:$0xff] }
  0x4a   :  { %589 = vperm.xlu1 %1310, %v313_v37   ;;  %584 = vperm.xlu0 %1309, %v312_v38   ;;  %v346_v37 = vld [vmem:[%s2003_s1 + $0x230] sm:$0xff] }
  0x4e   :  { %599 = vperm.xlu1 %1310, %v315_v39   ;;  %594 = vperm.xlu0 %1309, %v314_v40  }
  0x52   :  { %609 = vperm.xlu1 %1310, %v317_v41   ;;  %604 = vperm.xlu0 %1309, %v316_v42   ;;  %v28_v42 = vadd.s32 64, %v1541_v4 }
  0x54   :  { %vm158_vm10 = vcmp.eq.s32.totalorder %v28_v42, %v1550_v9 }
  0x56   :  { %619 = vperm.xlu1 %1310, %v319_v43   ;;  %614 = vperm.xlu0 %1309, %v318_v44  }
  0x5a   :  { %629 = vperm.xlu1 %1310, %v321_v45   ;;  %624 = vperm.xlu0 %1309, %v320_v46   ;;  %v29_v45 = vadd.s32 72, %v1541_v4  ;;  %v349_v46 = vld [vmem:[%s2003_s1 + $0x248] sm:$0xff] }
  0x5c   :  { %vm159_vm11 = vcmp.eq.s32.totalorder %v29_v45, %v1550_v9  ;;  %v360_v45 = vld [vmem:[%s2003_s1 + $0x2a0] sm:$0xff] }
  0x5e   :  { %639 = vperm.xlu1 %1310, %v323_v47   ;;  %634 = vperm.xlu0 %1309, %v322_v48   ;;  %v348_v47 = vld [vmem:[%s2003_s1 + $0x240] sm:$0xff] }
  0x62   :  { %649 = vperm.xlu1 %1310, %v325_v49   ;;  %644 = vperm.xlu0 %1309, %v324_v50  }
  0x66   :  { %659 = vperm.xlu1 %1310, %v327_v51   ;;  %654 = vperm.xlu0 %1309, %v326_v52   ;;  %v30_v52 = vadd.s32 80, %v1541_v4 }
  0x68   :  { %vm160_vm12 = vcmp.eq.s32.totalorder %v30_v52, %v1550_v9 }
  0x6a   :  { %669 = vperm.xlu1 %1310, %v329_v53   ;;  %664 = vperm.xlu0 %1309, %v328_v54  }
  0x6e   :  { %679 = vperm.xlu1 %1310, %v331_v56   ;;  %674 = vperm.xlu0 %1309, %v330_v57   ;;  %v351_v56 = vld [vmem:[%s2003_s1 + $0x258] sm:$0xff]  ;;  %v350_v57 = vld [vmem:[%s2003_s1 + $0x250] sm:$0xff] }
  0x72   :  { %689 = vperm.xlu1 %1310, %v333_v59   ;;  %684 = vperm.xlu0 %1309, %v332_v60  }
  0x76   :  { %699 = vperm.xlu1 %1310, %v335_v62   ;;  %694 = vperm.xlu0 %1309, %v334_v63   ;;  %v32_v62 = vadd.s32 96, %v1541_v4 }
  0x78   :  { %vm162_vm14 = vcmp.eq.s32.totalorder %v32_v62, %v1550_v9 }
  0x7a   :  { %709 = vperm.xlu1 %1310, %v337_v2   ;;  %704 = vperm.xlu0 %1309, %v336_v3   ;;  %v353_v2 = vld [vmem:[%s2003_s1 + $0x268] sm:$0xff]  ;;  %v352_v3 = vld [vmem:[%s2003_s1 + $0x260] sm:$0xff] }
  0x7e   :  { %719 = vperm.xlu1 %1310, %v339_v5   ;;  %714 = vperm.xlu0 %1309, %v338_v6  }
  0x81   :  { %v415_v13 = vpop.permute.xlu1 %414  ;;  %v405_v15 = vpop.permute.xlu0 %404 }
  0x82   :  { %729 = vperm.xlu1 %1310, %v341_v10   ;;  %724 = vperm.xlu0 %1309, %v340_v11   ;;  %v1032_v22 = vsel %vm150_vm2, %v405_v15, 0.0  ;;  %v1034_v28 = vsel %vm152_vm4, %v415_v13, 0.0  ;;  %v34_v10 = vadd.s32 112, %v1541_v4  ;;  %v35_v13 = vadd.s32 120, %v1541_v4  ;;  %v354_v15 = vld [vmem:[%s2003_s1 + $0x270] sm:$0xff] }
  0x84   :  { %vm164_vm0 = vcmp.eq.s32.totalorder %v34_v10, %v1550_v9  ;;  %vm165_vm1 = vcmp.eq.s32.totalorder %v35_v13, %v1550_v9  ;;  %v366_v13 = vld [vmem:[%s2003_s1 + $0x2d0] sm:$0xff] }
  0x85   :  { %v420_v19 = vpop.permute.xlu1 %419  ;;  %v410_v20 = vpop.permute.xlu0 %409 }
  0x86   :  { %v1033_v23 = vsel %vm151_vm3, %v410_v20, 0.0  ;;  %739 = vperm.xlu1 %1310, %v343_v17   ;;  %734 = vperm.xlu0 %1309, %v342_v18   ;;  %v1035_v33 = vsel %vm153_vm5, %v420_v19, 0.0  ;;  %v36_v20 = vadd.s32 128, %v1541_v4 }
  0x87   :  { %v1158_v24 = vadd.f32 %v1033_v23, %v1032_v22  ;;  %v37_v23 = vadd.s32 136, %v1541_v4 }
  0x88   :  { %vm166_vm2 = vcmp.eq.s32.totalorder %v36_v20, %v1550_v9 }
  0x89   :  { %v1159_v29 = vadd.f32 %v1158_v24, %v1034_v28  ;;  %v430_v30 = vpop.permute.xlu1 %429  ;;  %v425_v31 = vpop.permute.xlu0 %424  ;;  %v357_v24 = vld [vmem:[%s2003_s1 + $0x288] sm:$0xff]  ;;  %vm167_vm3 = vcmp.eq.s32.totalorder %v37_v23, %v1550_v9  ;;  %v368_v23 = vld [vmem:[%s2003_s1 + $0x2e0] sm:$0xff] }
  0x8a   :  { %749 = vperm.xlu1 %1310, %v345_v26   ;;  %744 = vperm.xlu0 %1309, %v344_v27   ;;  %v1036_v38 = vsel %vm154_vm6, %v425_v31, 0.0  ;;  %v1037_v43 = vsel %vm155_vm7, %v430_v30, 0.0  ;;  %v38_v30 = vadd.s32 144, %v1541_v4 }
  0x8b   :  { %v1160_v34 = vadd.f32 %v1159_v29, %v1035_v33  ;;  %v39_v33 = vadd.s32 152, %v1541_v4 }
  0x8c   :  { %vm168_vm4 = vcmp.eq.s32.totalorder %v38_v30, %v1550_v9 }
  0x8d   :  { %v1161_v39 = vadd.f32 %v1160_v34, %v1036_v38  ;;  %v440_v40 = vpop.permute.xlu1 %439  ;;  %v435_v41 = vpop.permute.xlu0 %434  ;;  %v359_v34 = vld [vmem:[%s2003_s1 + $0x298] sm:$0xff]  ;;  %vm169_vm5 = vcmp.eq.s32.totalorder %v39_v33, %v1550_v9  ;;  %v370_v33 = vld [vmem:[%s2003_s1 + $0x2f0] sm:$0xff] }
  0x8e   :  { %759 = vperm.xlu1 %1310, %v347_v36   ;;  %754 = vperm.xlu0 %1309, %v346_v37   ;;  %v1038_v48 = vsel %vm156_vm8, %v435_v41, 0.0  ;;  %v1039_v53 = vsel %vm157_vm9, %v440_v40, 0.0  ;;  %v40_v40 = vadd.s32 160, %v1541_v4 }
  0x8f   :  { %v1162_v44 = vadd.f32 %v1161_v39, %v1037_v43  ;;  %v41_v43 = vadd.s32 168, %v1541_v4 }
  0x90   :  { %vm170_vm6 = vcmp.eq.s32.totalorder %v40_v40, %v1550_v9 }
  0x91   :  { %v1163_v49 = vadd.f32 %v1162_v44, %v1038_v48  ;;  %v450_v50 = vpop.permute.xlu1 %449  ;;  %v445_v51 = vpop.permute.xlu0 %444  ;;  %v361_v44 = vld [vmem:[%s2003_s1 + $0x2a8] sm:$0xff]  ;;  %vm171_vm7 = vcmp.eq.s32.totalorder %v41_v43, %v1550_v9  ;;  %v372_v43 = vld [vmem:[%s2003_s1 + $0x300] sm:$0xff] }
  0x92   :  { %769 = vperm.xlu1 %1310, %v349_v46   ;;  %764 = vperm.xlu0 %1309, %v348_v47   ;;  %v1040_v58 = vsel %vm158_vm10, %v445_v51, 0.0  ;;  %v1041_v63 = vsel %vm159_vm11, %v450_v50, 0.0  ;;  %v42_v50 = vadd.s32 176, %v1541_v4 }
  0x93   :  { %v1164_v54 = vadd.f32 %v1163_v49, %v1039_v53  ;;  %v43_v53 = vadd.s32 184, %v1541_v4 }
  0x94   :  { %vm172_vm8 = vcmp.eq.s32.totalorder %v42_v50, %v1550_v9 }
  0x95   :  { %v1165_v59 = vadd.f32 %v1164_v54, %v1040_v58  ;;  %v460_v60 = vpop.permute.xlu1 %459  ;;  %v455_v61 = vpop.permute.xlu0 %454  ;;  %v363_v54 = vld [vmem:[%s2003_s1 + $0x2b8] sm:$0xff]  ;;  %vm173_vm9 = vcmp.eq.s32.totalorder %v43_v53, %v1550_v9  ;;  %v374_v53 = vld [vmem:[%s2003_s1 + $0x310] sm:$0xff] }
  0x96   :  { %779 = vperm.xlu1 %1310, %v351_v56   ;;  %774 = vperm.xlu0 %1309, %v350_v57   ;;  %v1042_v5 = vsel %vm160_vm12, %v455_v61, 0.0  ;;  %v1043_v11 = vsel %vm161_vm13, %v460_v60, 0.0  ;;  %v44_v60 = vadd.s32 192, %v1541_v4 }
  0x97   :  { %v1166_v0 = vadd.f32 %v1165_v59, %v1041_v63  ;;  %v45_v63 = vadd.s32 200, %v1541_v4 }
  0x98   :  { %vm174_vm10 = vcmp.eq.s32.totalorder %v44_v60, %v1550_v9 }
  0x99   :  { %v1167_v6 = vadd.f32 %v1166_v0, %v1042_v5  ;;  %v470_v7 = vpop.permute.xlu1 %469  ;;  %v465_v8 = vpop.permute.xlu0 %464  ;;  %v365_v0 = vld [vmem:[%s2003_s1 + $0x2c8] sm:$0xff]  ;;  %vm175_vm11 = vcmp.eq.s32.totalorder %v45_v63, %v1550_v9  ;;  %v376_v63 = vld [vmem:[%s2003_s1 + $0x320] sm:$0xff] }
  0x9a   :  { %789 = vperm.xlu1 %1310, %v353_v2   ;;  %784 = vperm.xlu0 %1309, %v352_v3   ;;  %v1044_v16 = vsel %vm162_vm14, %v465_v8, 0.0  ;;  %v1045_v21 = vsel %vm163_vm15, %v470_v7, 0.0  ;;  %v46_v7 = vadd.s32 208, %v1541_v4 }
  0x9b   :  { %v1168_v12 = vadd.f32 %v1167_v6, %v1043_v11  ;;  %v47_v11 = vadd.s32 216, %v1541_v4 }
  0x9c   :  { %vm176_vm12 = vcmp.eq.s32.totalorder %v46_v7, %v1550_v9 }
  0x9d   :  { %v1169_v17 = vadd.f32 %v1168_v12, %v1044_v16  ;;  %v480_v18 = vpop.permute.xlu1 %479  ;;  %v475_v19 = vpop.permute.xlu0 %474  ;;  %v367_v12 = vld [vmem:[%s2003_s1 + $0x2d8] sm:$0xff]  ;;  %vm177_vm13 = vcmp.eq.s32.totalorder %v47_v11, %v1550_v9  ;;  %v378_v11 = vld [vmem:[%s2003_s1 + $0x330] sm:$0xff] }
  0x9e   :  { %799 = vperm.xlu1 %1310, %v355_v14   ;;  %794 = vperm.xlu0 %1309, %v354_v15   ;;  %v1046_v26 = vsel %vm164_vm0, %v475_v19, 0.0  ;;  %v1047_v31 = vsel %vm165_vm1, %v480_v18, 0.0  ;;  %v48_v18 = vadd.s32 224, %v1541_v4 }
  0x9f   :  { %v1170_v22 = vadd.f32 %v1169_v17, %v1045_v21  ;;  %v49_v21 = vadd.s32 232, %v1541_v4 }
  0xa0   :  { %vm178_vm14 = vcmp.eq.s32.totalorder %v48_v18, %v1550_v9 }
  0xa1   :  { %v1171_v27 = vadd.f32 %v1170_v22, %v1046_v26  ;;  %v490_v28 = vpop.permute.xlu1 %489  ;;  %v485_v29 = vpop.permute.xlu0 %484  ;;  %v369_v22 = vld [vmem:[%s2003_s1 + $0x2e8] sm:$0xff]  ;;  %vm179_vm15 = vcmp.eq.s32.totalorder %v49_v21, %v1550_v9  ;;  %v380_v21 = vld [vmem:[%s2003_s1 + $0x340] sm:$0xff] }
  0xa2   :  { %809 = vperm.xlu1 %1310, %v357_v24   ;;  %804 = vperm.xlu0 %1309, %v356_v25   ;;  %v1048_v36 = vsel %vm166_vm2, %v485_v29, 0.0  ;;  %v1049_v41 = vsel %vm167_vm3, %v490_v28, 0.0  ;;  %v50_v28 = vadd.s32 240, %v1541_v4 }
  0xa3   :  { %v1172_v32 = vadd.f32 %v1171_v27, %v1047_v31  ;;  %v51_v31 = vadd.s32 248, %v1541_v4 }
  0xa4   :  { %vm180_vm0 = vcmp.eq.s32.totalorder %v50_v28, %v1550_v9 }
  0xa5   :  { %v1173_v37 = vadd.f32 %v1172_v32, %v1048_v36  ;;  %v500_v38 = vpop.permute.xlu1 %499  ;;  %v495_v39 = vpop.permute.xlu0 %494  ;;  %v371_v32 = vld [vmem:[%s2003_s1 + $0x2f8] sm:$0xff]  ;;  %vm181_vm1 = vcmp.eq.s32.totalorder %v51_v31, %v1550_v9  ;;  %v382_v31 = vld [vmem:[%s2003_s1 + $0x350] sm:$0xff] }
  0xa6   :  { %819 = vperm.xlu1 %1310, %v359_v34   ;;  %814 = vperm.xlu0 %1309, %v358_v35   ;;  %v1050_v46 = vsel %vm168_vm4, %v495_v39, 0.0  ;;  %v1051_v51 = vsel %vm169_vm5, %v500_v38, 0.0  ;;  %v52_v38 = vadd.s32 256, %v1541_v4 }
  0xa7   :  { %v1174_v42 = vadd.f32 %v1173_v37, %v1049_v41  ;;  %v53_v41 = vadd.s32 264, %v1541_v4 }
  0xa8   :  { %vm182_vm2 = vcmp.eq.s32.totalorder %v52_v38, %v1550_v9 }
  0xa9   :  { %v1175_v47 = vadd.f32 %v1174_v42, %v1050_v46  ;;  %v510_v48 = vpop.permute.xlu1 %509  ;;  %v505_v49 = vpop.permute.xlu0 %504  ;;  %v373_v42 = vld [vmem:[%s2003_s1 + $0x308] sm:$0xff]  ;;  %vm183_vm3 = vcmp.eq.s32.totalorder %v53_v41, %v1550_v9  ;;  %v384_v41 = vld [vmem:[%s2003_s1 + $0x360] sm:$0xff] }
  0xaa   :  { %829 = vperm.xlu1 %1310, %v361_v44   ;;  %824 = vperm.xlu0 %1309, %v360_v45   ;;  %v1052_v56 = vsel %vm170_vm6, %v505_v49, 0.0  ;;  %v1053_v61 = vsel %vm171_vm7, %v510_v48, 0.0  ;;  %v54_v48 = vadd.s32 272, %v1541_v4 }
  0xab   :  { %v1176_v52 = vadd.f32 %v1175_v47, %v1051_v51  ;;  %v55_v51 = vadd.s32 280, %v1541_v4 }
  0xac   :  { %vm184_vm4 = vcmp.eq.s32.totalorder %v54_v48, %v1550_v9 }
  0xad   :  { %v1177_v57 = vadd.f32 %v1176_v52, %v1052_v56  ;;  %v520_v58 = vpop.permute.xlu1 %519  ;;  %v515_v59 = vpop.permute.xlu0 %514  ;;  %v375_v52 = vld [vmem:[%s2003_s1 + $0x318] sm:$0xff]  ;;  %vm185_vm5 = vcmp.eq.s32.totalorder %v55_v51, %v1550_v9  ;;  %v386_v51 = vld [vmem:[%s2003_s1 + $0x370] sm:$0xff] }
  0xae   :  { %839 = vperm.xlu1 %1310, %v363_v54   ;;  %834 = vperm.xlu0 %1309, %v362_v55   ;;  %v1054_v2 = vsel %vm172_vm8, %v515_v59, 0.0  ;;  %v1055_v8 = vsel %vm173_vm9, %v520_v58, 0.0  ;;  %v56_v58 = vadd.s32 288, %v1541_v4 }
  0xaf   :  { %v1178_v62 = vadd.f32 %v1177_v57, %v1053_v61  ;;  %v57_v61 = vadd.s32 296, %v1541_v4 }
  0xb0   :  { %vm186_vm6 = vcmp.eq.s32.totalorder %v56_v58, %v1550_v9 }
  0xb1   :  { %v1179_v3 = vadd.f32 %v1178_v62, %v1054_v2  ;;  %v530_v5 = vpop.permute.xlu1 %529  ;;  %v525_v6 = vpop.permute.xlu0 %524  ;;  %v377_v62 = vld [vmem:[%s2003_s1 + $0x328] sm:$0xff]  ;;  %vm187_vm7 = vcmp.eq.s32.totalorder %v57_v61, %v1550_v9  ;;  %v388_v61 = vld [vmem:[%s2003_s1 + $0x380] sm:$0xff] }
  0xb2   :  { %849 = vperm.xlu1 %1310, %v365_v0   ;;  %844 = vperm.xlu0 %1309, %v364_v1   ;;  %v1056_v14 = vsel %vm174_vm10, %v525_v6, 0.0  ;;  %v1057_v19 = vsel %vm175_vm11, %v530_v5, 0.0  ;;  %v58_v5 = vadd.s32 304, %v1541_v4 }
  0xb3   :  { %v1180_v10 = vadd.f32 %v1179_v3, %v1055_v8  ;;  %v59_v8 = vadd.s32 312, %v1541_v4 }
  0xb4   :  { %vm188_vm8 = vcmp.eq.s32.totalorder %v58_v5, %v1550_v9 }
  0xb5   :  { %v1181_v15 = vadd.f32 %v1180_v10, %v1056_v14  ;;  %v540_v16 = vpop.permute.xlu1 %539  ;;  %v535_v17 = vpop.permute.xlu0 %534  ;;  %v379_v10 = vld [vmem:[%s2003_s1 + $0x338] sm:$0xff]  ;;  %vm189_vm9 = vcmp.eq.s32.totalorder %v59_v8, %v1550_v9  ;;  %v390_v8 = vld [vmem:[%s2003_s1 + $0x390] sm:$0xff] }
  0xb6   :  { %859 = vperm.xlu1 %1310, %v367_v12   ;;  %854 = vperm.xlu0 %1309, %v366_v13   ;;  %v1058_v24 = vsel %vm176_vm12, %v535_v17, 0.0  ;;  %v1059_v29 = vsel %vm177_vm13, %v540_v16, 0.0  ;;  %v60_v16 = vadd.s32 320, %v1541_v4 }
  0xb7   :  { %v1182_v20 = vadd.f32 %v1181_v15, %v1057_v19  ;;  %v61_v19 = vadd.s32 328, %v1541_v4 }
  0xb8   :  { %vm190_vm10 = vcmp.eq.s32.totalorder %v60_v16, %v1550_v9 }
  0xb9   :  { %v1183_v25 = vadd.f32 %v1182_v20, %v1058_v24  ;;  %v550_v26 = vpop.permute.xlu1 %549  ;;  %v545_v27 = vpop.permute.xlu0 %544  ;;  %v381_v20 = vld [vmem:[%s2003_s1 + $0x348] sm:$0xff]  ;;  %vm191_vm11 = vcmp.eq.s32.totalorder %v61_v19, %v1550_v9  ;;  %v392_v19 = vld [vmem:[%s2003_s1 + $0x3a0] sm:$0xff] }
  0xba   :  { %869 = vperm.xlu1 %1310, %v369_v22   ;;  %864 = vperm.xlu0 %1309, %v368_v23   ;;  %v1060_v34 = vsel %vm178_vm14, %v545_v27, 0.0  ;;  %v1061_v39 = vsel %vm179_vm15, %v550_v26, 0.0  ;;  %v62_v26 = vadd.s32 336, %v1541_v4 }
  0xbb   :  { %v1184_v30 = vadd.f32 %v1183_v25, %v1059_v29  ;;  %v63_v29 = vadd.s32 344, %v1541_v4 }
  0xbc   :  { %vm192_vm12 = vcmp.eq.s32.totalorder %v62_v26, %v1550_v9 }
  0xbd   :  { %v1185_v35 = vadd.f32 %v1184_v30, %v1060_v34  ;;  %v560_v36 = vpop.permute.xlu1 %559  ;;  %v555_v37 = vpop.permute.xlu0 %554  ;;  %v383_v30 = vld [vmem:[%s2003_s1 + $0x358] sm:$0xff]  ;;  %vm193_vm13 = vcmp.eq.s32.totalorder %v63_v29, %v1550_v9  ;;  %v394_v29 = vld [vmem:[%s2003_s1 + $0x3b0] sm:$0xff] }
  0xbe   :  { %879 = vperm.xlu1 %1310, %v371_v32   ;;  %874 = vperm.xlu0 %1309, %v370_v33   ;;  %v1062_v44 = vsel %vm180_vm0, %v555_v37, 0.0  ;;  %v1063_v49 = vsel %vm181_vm1, %v560_v36, 0.0  ;;  %v64_v36 = vadd.s32 352, %v1541_v4 }
  0xbf   :  { %v1186_v40 = vadd.f32 %v1185_v35, %v1061_v39  ;;  %v65_v39 = vadd.s32 360, %v1541_v4 }
  0xc0   :  { %vm194_vm14 = vcmp.eq.s32.totalorder %v64_v36, %v1550_v9 }
  0xc1   :  { %v1187_v45 = vadd.f32 %v1186_v40, %v1062_v44  ;;  %v570_v46 = vpop.permute.xlu1 %569  ;;  %v565_v47 = vpop.permute.xlu0 %564  ;;  %v385_v40 = vld [vmem:[%s2003_s1 + $0x368] sm:$0xff]  ;;  %vm195_vm15 = vcmp.eq.s32.totalorder %v65_v39, %v1550_v9  ;;  %v396_v39 = vld [vmem:[%s2003_s1 + $0x3c0] sm:$0xff] }
  0xc2   :  { %889 = vperm.xlu1 %1310, %v373_v42   ;;  %884 = vperm.xlu0 %1309, %v372_v43   ;;  %v1064_v54 = vsel %vm182_vm2, %v565_v47, 0.0  ;;  %v1065_v59 = vsel %vm183_vm3, %v570_v46, 0.0  ;;  %v66_v46 = vadd.s32 368, %v1541_v4 }
  0xc3   :  { %v1188_v50 = vadd.f32 %v1187_v45, %v1063_v49  ;;  %v67_v49 = vadd.s32 376, %v1541_v4 }
  0xc4   :  { %vm196_vm0 = vcmp.eq.s32.totalorder %v66_v46, %v1550_v9 }
  0xc5   :  { %v1189_v55 = vadd.f32 %v1188_v50, %v1064_v54  ;;  %v580_v56 = vpop.permute.xlu1 %579  ;;  %v575_v57 = vpop.permute.xlu0 %574  ;;  %v387_v50 = vld [vmem:[%s2003_s1 + $0x378] sm:$0xff]  ;;  %vm197_vm1 = vcmp.eq.s32.totalorder %v67_v49, %v1550_v9  ;;  %v398_v49 = vld [vmem:[%s2003_s1 + $0x3d0] sm:$0xff] }
  0xc6   :  { %899 = vperm.xlu1 %1310, %v375_v52   ;;  %894 = vperm.xlu0 %1309, %v374_v53   ;;  %v1066_v0 = vsel %vm184_vm4, %v575_v57, 0.0  ;;  %v1067_v6 = vsel %vm185_vm5, %v580_v56, 0.0  ;;  %v68_v56 = vadd.s32 384, %v1541_v4 }
  0xc7   :  { %v1190_v60 = vadd.f32 %v1189_v55, %v1065_v59  ;;  %v69_v59 = vadd.s32 392, %v1541_v4 }
  0xc8   :  { %vm198_vm2 = vcmp.eq.s32.totalorder %v68_v56, %v1550_v9 }
  0xc9   :  { %v1191_v1 = vadd.f32 %v1190_v60, %v1066_v0  ;;  %v590_v2 = vpop.permute.xlu1 %589  ;;  %v585_v3 = vpop.permute.xlu0 %584  ;;  %v389_v60 = vld [vmem:[%s2003_s1 + $0x388] sm:$0xff]  ;;  %vm199_vm3 = vcmp.eq.s32.totalorder %v69_v59, %v1550_v9  ;;  %v400_v59 = vld [vmem:[%s2003_s1 + $0x3e0] sm:$0xff] }
  0xca   :  { %909 = vperm.xlu1 %1310, %v377_v62   ;;  %904 = vperm.xlu0 %1309, %v376_v63   ;;  %v1068_v12 = vsel %vm186_vm6, %v585_v3, 0.0  ;;  %v1069_v17 = vsel %vm187_vm7, %v590_v2, 0.0  ;;  %v70_v2 = vadd.s32 400, %v1541_v4 }
  0xcb   :  { %v1192_v7 = vadd.f32 %v1191_v1, %v1067_v6  ;;  %v71_v6 = vadd.s32 408, %v1541_v4 }
  0xcc   :  { %vm200_vm4 = vcmp.eq.s32.totalorder %v70_v2, %v1550_v9 }
  0xcd   :  { %v1193_v13 = vadd.f32 %v1192_v7, %v1068_v12  ;;  %v600_v14 = vpop.permute.xlu1 %599  ;;  %v595_v15 = vpop.permute.xlu0 %594  ;;  %v391_v7 = vld [vmem:[%s2003_s1 + $0x398] sm:$0xff]  ;;  %vm201_vm5 = vcmp.eq.s32.totalorder %v71_v6, %v1550_v9 }
  0xce   :  { %919 = vperm.xlu1 %1310, %v379_v10   ;;  %914 = vperm.xlu0 %1309, %v378_v11   ;;  %v1070_v22 = vsel %vm188_vm8, %v595_v15, 0.0  ;;  %v1071_v27 = vsel %vm189_vm9, %v600_v14, 0.0  ;;  %v72_v14 = vadd.s32 416, %v1541_v4 }
  0xcf   :  { %v1194_v18 = vadd.f32 %v1193_v13, %v1069_v17  ;;  %v73_v17 = vadd.s32 424, %v1541_v4 }
  0xd0   :  { %vm202_vm6 = vcmp.eq.s32.totalorder %v72_v14, %v1550_v9 }
  0xd1   :  { %v1195_v23 = vadd.f32 %v1194_v18, %v1070_v22  ;;  %v610_v24 = vpop.permute.xlu1 %609  ;;  %v605_v25 = vpop.permute.xlu0 %604  ;;  %v393_v18 = vld [vmem:[%s2003_s1 + $0x3a8] sm:$0xff]  ;;  %vm203_vm7 = vcmp.eq.s32.totalorder %v73_v17, %v1550_v9 }
  0xd2   :  { %929 = vperm.xlu1 %1310, %v381_v20   ;;  %924 = vperm.xlu0 %1309, %v380_v21   ;;  %v1072_v32 = vsel %vm190_vm10, %v605_v25, 0.0  ;;  %v1073_v37 = vsel %vm191_vm11, %v610_v24, 0.0  ;;  %v74_v24 = vadd.s32 432, %v1541_v4 }
  0xd3   :  { %v1196_v28 = vadd.f32 %v1195_v23, %v1071_v27  ;;  %v75_v27 = vadd.s32 440, %v1541_v4 }
  0xd4   :  { %vm204_vm8 = vcmp.eq.s32.totalorder %v74_v24, %v1550_v9 }
  0xd5   :  { %v1197_v33 = vadd.f32 %v1196_v28, %v1072_v32  ;;  %v620_v34 = vpop.permute.xlu1 %619  ;;  %v615_v35 = vpop.permute.xlu0 %614  ;;  %v395_v28 = vld [vmem:[%s2003_s1 + $0x3b8] sm:$0xff]  ;;  %vm205_vm9 = vcmp.eq.s32.totalorder %v75_v27, %v1550_v9 }
  0xd6   :  { %939 = vperm.xlu1 %1310, %v383_v30   ;;  %934 = vperm.xlu0 %1309, %v382_v31   ;;  %v1074_v42 = vsel %vm192_vm12, %v615_v35, 0.0  ;;  %v1075_v47 = vsel %vm193_vm13, %v620_v34, 0.0  ;;  %v76_v34 = vadd.s32 448, %v1541_v4 }
  0xd7   :  { %v1198_v38 = vadd.f32 %v1197_v33, %v1073_v37  ;;  %v77_v37 = vadd.s32 456, %v1541_v4 }
  0xd8   :  { %vm206_vm10 = vcmp.eq.s32.totalorder %v76_v34, %v1550_v9  ;;  %v90_v34 = vadd.s32 560, %v1541_v4 }
  0xd9   :  { %v1199_v43 = vadd.f32 %v1198_v38, %v1074_v42  ;;  %v630_v44 = vpop.permute.xlu1 %629  ;;  %v625_v45 = vpop.permute.xlu0 %624  ;;  %v397_v38 = vld [vmem:[%s2003_s1 + $0x3c8] sm:$0xff]  ;;  %vm207_vm11 = vcmp.eq.s32.totalorder %v77_v37, %v1550_v9  ;;  %v91_v37 = vadd.s32 568, %v1541_v4 }
  0xda   :  { %949 = vperm.xlu1 %1310, %v385_v40   ;;  %944 = vperm.xlu0 %1309, %v384_v41   ;;  %v1076_v52 = vsel %vm194_vm14, %v625_v45, 0.0  ;;  %v1077_v57 = vsel %vm195_vm15, %v630_v44, 0.0  ;;  %v78_v44 = vadd.s32 464, %v1541_v4 }
  0xdb   :  { %v1200_v48 = vadd.f32 %v1199_v43, %v1075_v47  ;;  %v79_v47 = vadd.s32 472, %v1541_v4 }
  0xdc   :  { %vm208_vm12 = vcmp.eq.s32.totalorder %v78_v44, %v1550_v9 }
  0xdd   :  { %v1201_v53 = vadd.f32 %v1200_v48, %v1076_v52  ;;  %v640_v54 = vpop.permute.xlu1 %639  ;;  %v635_v55 = vpop.permute.xlu0 %634  ;;  %v399_v48 = vld [vmem:[%s2003_s1 + $0x3d8] sm:$0xff]  ;;  %vm209_vm13 = vcmp.eq.s32.totalorder %v79_v47, %v1550_v9 }
  0xde   :  { %959 = vperm.xlu1 %1310, %v387_v50   ;;  %954 = vperm.xlu0 %1309, %v386_v51   ;;  %v1078_v62 = vsel %vm196_vm0, %v635_v55, 0.0  ;;  %v1079_v3 = vsel %vm197_vm1, %v640_v54, 0.0  ;;  %v80_v54 = vadd.s32 480, %v1541_v4 }
  0xdf   :  { %v1202_v58 = vadd.f32 %v1201_v53, %v1077_v57  ;;  %v81_v57 = vadd.s32 488, %v1541_v4 }
  0xe0   :  { %vm210_vm14 = vcmp.eq.s32.totalorder %v80_v54, %v1550_v9 }
  0xe1   :  { %v1203_v63 = vadd.f32 %v1202_v58, %v1078_v62  ;;  %v650_v0 = vpop.permute.xlu1 %649  ;;  %v645_v1 = vpop.permute.xlu0 %644  ;;  %v401_v58 = vld [vmem:[%s2003_s1 + $0x3e8] sm:$0xff]  ;;  %vm211_vm15 = vcmp.eq.s32.totalorder %v81_v57, %v1550_v9  ;;  %s1336_s1 = smov [#allocation2]  }
  0xe2   :  { %969 = vperm.xlu1 %1310, %v389_v60   ;;  %964 = vperm.xlu0 %1309, %v388_v61   ;;  %v1080_v10 = vsel %vm198_vm2, %v645_v1, 0.0  ;;  %v1081_v15 = vsel %vm199_vm3, %v650_v0, 0.0  ;;  %v82_v0 = vadd.s32 496, %v1541_v4  ;;  %s1296_s6 = sshll.u32 %s1336_s1, 4  ;;  %s1297_s6 = int_to_ptr.vmem [resolvable:$true] %s1296_s6 }
  0xe3   :  { %v1204_v5 = vadd.f32 %v1203_v63, %v1079_v3  ;;  %v83_v3 = vadd.s32 504, %v1541_v4  ;;  %s1311_s7 = scalar_lea.vmem %s1297_s6, 16  ;;  %s1315_s8 = scalar_lea.vmem %s1297_s6, 32 }
  0xe4   :  { %vm212_vm0 = vcmp.eq.s32.totalorder %v82_v0, %v1550_v9  ;;  %p1312_p0 = scmp.ne.s32.totalorder %s1297_s6, %s1311_s7  ;;  %p1316_p1 = scmp.lt.s32.totalorder %s1297_s6, %s1297_s6 }
  0xe5   :  { %v1205_v11 = vadd.f32 %v1204_v5, %v1080_v10  ;;  %v660_v12 = vpop.permute.xlu1 %659  ;;  %v655_v13 = vpop.permute.xlu0 %654  ;;  %v84_v10 = vadd.s32 512, %v1541_v4  ;;  %vm213_vm1 = vcmp.eq.s32.totalorder %v83_v3, %v1550_v9  ;;  %p1317_p2 = scmp.lt.s32.totalorder %s1315_s8, %s1311_s7 }
  0xe6   :  { %979 = vperm.xlu1 %1310, %v391_v7   ;;  %974 = vperm.xlu0 %1309, %v390_v8   ;;  %v1082_v20 = vsel %vm200_vm4, %v655_v13, 0.0  ;;  %v1083_v25 = vsel %vm201_vm5, %v660_v12, 0.0  ;;  %v85_v13 = vadd.s32 520, %v1541_v4 }
  0xe7   :  { %v1206_v16 = vadd.f32 %v1205_v11, %v1081_v15  ;;  %vm214_vm2 = vcmp.eq.s32.totalorder %v84_v10, %v1550_v9  ;;  %p1318_p3 = por %p1317_p2, %p1316_p1 }
  0xe8   :  { %vm215_vm3 = vcmp.eq.s32.totalorder %v85_v13, %v1550_v9 }
  0xe9   :  { %v1207_v21 = vadd.f32 %v1206_v16, %v1082_v20  ;;  %v670_v22 = vpop.permute.xlu1 %669  ;;  %v665_v23 = vpop.permute.xlu0 %664  ;;  %p1319_p4 = pnand %p1318_p3, %p1312_p0 }
  0xea   :  { %989 = vperm.xlu1 %1310, %v393_v18   ;;  %984 = vperm.xlu0 %1309, %v392_v19   ;;  %v1084_v30 = vsel %vm202_vm6, %v665_v23, 0.0  ;;  %v1085_v35 = vsel %vm203_vm7, %v670_v22, 0.0  ;;  %v86_v18 = vadd.s32 528, %v1541_v4 }
  0xeb   :  { %v1208_v26 = vadd.f32 %v1207_v21, %v1083_v25  ;;  %v87_v21 = vadd.s32 536, %v1541_v4 }
  0xec   :  { %vm216_vm4 = vcmp.eq.s32.totalorder %v86_v18, %v1550_v9 }
  0xed   :  { %v1209_v31 = vadd.f32 %v1208_v26, %v1084_v30  ;;  %v680_v32 = vpop.permute.xlu1 %679  ;;  %v675_v33 = vpop.permute.xlu0 %674  ;;  %v88_v26 = vadd.s32 544, %v1541_v4  ;;  %vm217_vm5 = vcmp.eq.s32.totalorder %v87_v21, %v1550_v9 }
  0xee   :  { %999 = vperm.xlu1 %1310, %v395_v28   ;;  %994 = vperm.xlu0 %1309, %v394_v29   ;;  %v1086_v40 = vsel %vm204_vm8, %v675_v33, 0.0  ;;  %v1087_v45 = vsel %vm205_vm9, %v680_v32, 0.0  ;;  %v89_v29 = vadd.s32 552, %v1541_v4  ;;  %vm220_vm8 = vcmp.eq.s32.totalorder %v90_v34, %v1550_v9 }
  0xef   :  { %v1210_v36 = vadd.f32 %v1209_v31, %v1085_v35  ;;  %vm218_vm6 = vcmp.eq.s32.totalorder %v88_v26, %v1550_v9  ;;  %vm221_vm9 = vcmp.eq.s32.totalorder %v91_v37, %v1550_v9 }
  0xf0   :  { %vm219_vm7 = vcmp.eq.s32.totalorder %v89_v29, %v1550_v9 }
  0xf1   :  { %v1211_v41 = vadd.f32 %v1210_v36, %v1086_v40  ;;  %v690_v42 = vpop.permute.xlu1 %689  ;;  %v685_v43 = vpop.permute.xlu0 %684 }
  0xf2   :  { %1009 = vperm.xlu1 %1310, %v397_v38   ;;  %1004 = vperm.xlu0 %1309, %v396_v39   ;;  %v1088_v50 = vsel %vm206_vm10, %v685_v43, 0.0  ;;  %v1089_v55 = vsel %vm207_vm11, %v690_v42, 0.0  ;;  %v92_v42 = vadd.s32 576, %v1541_v4 }
  0xf3   :  { %v1212_v46 = vadd.f32 %v1211_v41, %v1087_v45  ;;  %v93_v45 = vadd.s32 584, %v1541_v4 }
  0xf4   :  { %vm222_vm10 = vcmp.eq.s32.totalorder %v92_v42, %v1550_v9 }
  0xf5   :  { %v1213_v51 = vadd.f32 %v1212_v46, %v1088_v50  ;;  %v700_v52 = vpop.permute.xlu1 %699  ;;  %v695_v53 = vpop.permute.xlu0 %694  ;;  %v94_v50 = vadd.s32 592, %v1541_v4  ;;  %vm223_vm11 = vcmp.eq.s32.totalorder %v93_v45, %v1550_v9 }
  0xf6   :  { %1019 = vperm.xlu1 %1310, %v399_v48   ;;  %1014 = vperm.xlu0 %1309, %v398_v49   ;;  %v1090_v60 = vsel %vm208_vm12, %v695_v53, 0.0  ;;  %v1091_v1 = vsel %vm209_vm13, %v700_v52, 0.0  ;;  %v95_v53 = vadd.s32 600, %v1541_v4 }
  0xf7   :  { %v1214_v56 = vadd.f32 %v1213_v51, %v1089_v55  ;;  %vm224_vm12 = vcmp.eq.s32.totalorder %v94_v50, %v1550_v9 }
  0xf8   :  { %vm225_vm13 = vcmp.eq.s32.totalorder %v95_v53, %v1550_v9 }
  0xf9   :  { %v1215_v61 = vadd.f32 %v1214_v56, %v1090_v60  ;;  %v710_v62 = vpop.permute.xlu1 %709  ;;  %v705_v63 = vpop.permute.xlu0 %704 }
  0xfa   :  { %1029 = vperm.xlu1 %1310, %v401_v58   ;;  %1024 = vperm.xlu0 %1309, %v400_v59   ;;  %v1092_v5 = vsel %vm210_vm14, %v705_v63, 0.0  ;;  %v1093_v11 = vsel %vm211_vm15, %v710_v62, 0.0  ;;  %v96_v58 = vadd.s32 608, %v1541_v4 }
  0xfb   :  { %v1216_v2 = vadd.f32 %v1215_v61, %v1091_v1  ;;  %v97_v61 = vadd.s32 616, %v1541_v4 }
  0xfc   :  { %vm226_vm14 = vcmp.eq.s32.totalorder %v96_v58, %v1550_v9 }
  0xfd   :  { %v1217_v6 = vadd.f32 %v1216_v2, %v1092_v5  ;;  %v720_v7 = vpop.permute.xlu1 %719  ;;  %v715_v8 = vpop.permute.xlu0 %714  ;;  %v98_v2 = vadd.s32 624, %v1541_v4  ;;  %vm227_vm15 = vcmp.eq.s32.totalorder %v97_v61, %v1550_v9 }
  0xfe   :  { %v1094_v14 = vsel %vm212_vm0, %v715_v8, 0.0  ;;  %v1095_v19 = vsel %vm213_vm1, %v720_v7, 0.0 }
  0xff   :  { %v1218_v12 = vadd.f32 %v1217_v6, %v1093_v11  ;;  %v99_v6 = vadd.s32 632, %v1541_v4  ;;  %vm228_vm0 = vcmp.eq.s32.totalorder %v98_v2, %v1550_v9 }
 0x101   :  { %v1219_v15 = vadd.f32 %v1218_v12, %v1094_v14  ;;  %v730_v16 = vpop.permute.xlu1 %729  ;;  %v725_v17 = vpop.permute.xlu0 %724  ;;  %v100_v12 = vadd.s32 640, %v1541_v4  ;;  %vm229_vm1 = vcmp.eq.s32.totalorder %v99_v6, %v1550_v9 }
 0x102   :  { %v1096_v22 = vsel %vm214_vm2, %v725_v17, 0.0  ;;  %v1097_v27 = vsel %vm215_vm3, %v730_v16, 0.0 }
 0x103   :  { %v1220_v20 = vadd.f32 %v1219_v15, %v1095_v19  ;;  %v101_v15 = vadd.s32 648, %v1541_v4  ;;  %vm230_vm2 = vcmp.eq.s32.totalorder %v100_v12, %v1550_v9 }
 0x105   :  { %v1221_v23 = vadd.f32 %v1220_v20, %v1096_v22  ;;  %v740_v24 = vpop.permute.xlu1 %739  ;;  %v735_v25 = vpop.permute.xlu0 %734  ;;  %v102_v20 = vadd.s32 656, %v1541_v4  ;;  %vm231_vm3 = vcmp.eq.s32.totalorder %v101_v15, %v1550_v9 }
 0x106   :  { %v1098_v30 = vsel %vm216_vm4, %v735_v25, 0.0  ;;  %v1099_v35 = vsel %vm217_vm5, %v740_v24, 0.0 }
 0x107   :  { %v1222_v28 = vadd.f32 %v1221_v23, %v1097_v27  ;;  %v103_v23 = vadd.s32 664, %v1541_v4  ;;  %vm232_vm4 = vcmp.eq.s32.totalorder %v102_v20, %v1550_v9 }
 0x109   :  { %v1223_v31 = vadd.f32 %v1222_v28, %v1098_v30  ;;  %v750_v32 = vpop.permute.xlu1 %749  ;;  %v745_v33 = vpop.permute.xlu0 %744  ;;  %v104_v28 = vadd.s32 672, %v1541_v4  ;;  %vm233_vm5 = vcmp.eq.s32.totalorder %v103_v23, %v1550_v9 }
 0x10a   :  { %v1100_v38 = vsel %vm218_vm6, %v745_v33, 0.0  ;;  %v1101_v43 = vsel %vm219_vm7, %v750_v32, 0.0 }
 0x10b   :  { %v1224_v36 = vadd.f32 %v1223_v31, %v1099_v35  ;;  %v105_v31 = vadd.s32 680, %v1541_v4  ;;  %vm234_vm6 = vcmp.eq.s32.totalorder %v104_v28, %v1550_v9 }
 0x10d   :  { %v1225_v39 = vadd.f32 %v1224_v36, %v1100_v38  ;;  %v760_v40 = vpop.permute.xlu1 %759  ;;  %v755_v41 = vpop.permute.xlu0 %754  ;;  %v106_v36 = vadd.s32 688, %v1541_v4  ;;  %vm235_vm7 = vcmp.eq.s32.totalorder %v105_v31, %v1550_v9 }
 0x10e   :  { %v1102_v46 = vsel %vm220_vm8, %v755_v41, 0.0  ;;  %v1103_v51 = vsel %vm221_vm9, %v760_v40, 0.0 }
 0x10f   :  { %v1226_v44 = vadd.f32 %v1225_v39, %v1101_v43  ;;  %v107_v39 = vadd.s32 696, %v1541_v4  ;;  %vm236_vm8 = vcmp.eq.s32.totalorder %v106_v36, %v1550_v9 }
 0x111   :  { %v1227_v47 = vadd.f32 %v1226_v44, %v1102_v46  ;;  %v770_v48 = vpop.permute.xlu1 %769  ;;  %v765_v49 = vpop.permute.xlu0 %764  ;;  %v108_v44 = vadd.s32 704, %v1541_v4  ;;  %vm237_vm9 = vcmp.eq.s32.totalorder %v107_v39, %v1550_v9 }
 0x112   :  { %v1104_v54 = vsel %vm222_vm10, %v765_v49, 0.0  ;;  %v1105_v59 = vsel %vm223_vm11, %v770_v48, 0.0 }
 0x113   :  { %v1228_v52 = vadd.f32 %v1227_v47, %v1103_v51  ;;  %v109_v47 = vadd.s32 712, %v1541_v4  ;;  %vm238_vm10 = vcmp.eq.s32.totalorder %v108_v44, %v1550_v9 }
 0x115   :  { %v1229_v55 = vadd.f32 %v1228_v52, %v1104_v54  ;;  %v780_v56 = vpop.permute.xlu1 %779  ;;  %v775_v57 = vpop.permute.xlu0 %774  ;;  %v110_v52 = vadd.s32 720, %v1541_v4  ;;  %vm239_vm11 = vcmp.eq.s32.totalorder %v109_v47, %v1550_v9 }
 0x116   :  { %v1106_v62 = vsel %vm224_vm12, %v775_v57, 0.0  ;;  %v1107_v3 = vsel %vm225_vm13, %v780_v56, 0.0 }
 0x117   :  { %v1230_v60 = vadd.f32 %v1229_v55, %v1105_v59  ;;  %v111_v55 = vadd.s32 728, %v1541_v4  ;;  %vm240_vm12 = vcmp.eq.s32.totalorder %v110_v52, %v1550_v9 }
 0x119   :  { %v1231_v63 = vadd.f32 %v1230_v60, %v1106_v62  ;;  %v790_v0 = vpop.permute.xlu1 %789  ;;  %v785_v1 = vpop.permute.xlu0 %784  ;;  %v112_v60 = vadd.s32 736, %v1541_v4  ;;  %vm241_vm13 = vcmp.eq.s32.totalorder %v111_v55, %v1550_v9 }
 0x11a   :  { %v1108_v7 = vsel %vm226_vm14, %v785_v1, 0.0  ;;  %v1109_v13 = vsel %vm227_vm15, %v790_v0, 0.0 }
 0x11b   :  { %v1232_v5 = vadd.f32 %v1231_v63, %v1107_v3  ;;  %v113_v63 = vadd.s32 744, %v1541_v4  ;;  %vm242_vm14 = vcmp.eq.s32.totalorder %v112_v60, %v1550_v9 }
 0x11d   :  { %v1233_v8 = vadd.f32 %v1232_v5, %v1108_v7  ;;  %v800_v10 = vpop.permute.xlu1 %799  ;;  %v795_v11 = vpop.permute.xlu0 %794  ;;  %v114_v5 = vadd.s32 752, %v1541_v4  ;;  %vm243_vm15 = vcmp.eq.s32.totalorder %v113_v63, %v1550_v9 }
 0x11e   :  { %v1110_v16 = vsel %vm228_vm0, %v795_v11, 0.0  ;;  %v1111_v21 = vsel %vm229_vm1, %v800_v10, 0.0 }
 0x11f   :  { %v1234_v14 = vadd.f32 %v1233_v8, %v1109_v13  ;;  %v115_v8 = vadd.s32 760, %v1541_v4  ;;  %vm244_vm0 = vcmp.eq.s32.totalorder %v114_v5, %v1550_v9 }
 0x121   :  { %v1235_v17 = vadd.f32 %v1234_v14, %v1110_v16  ;;  %v810_v18 = vpop.permute.xlu1 %809  ;;  %v805_v19 = vpop.permute.xlu0 %804  ;;  %v116_v14 = vadd.s32 768, %v1541_v4  ;;  %vm245_vm1 = vcmp.eq.s32.totalorder %v115_v8, %v1550_v9 }
 0x122   :  { %v1112_v24 = vsel %vm230_vm2, %v805_v19, 0.0  ;;  %v1113_v29 = vsel %vm231_vm3, %v810_v18, 0.0 }
 0x123   :  { %v1236_v22 = vadd.f32 %v1235_v17, %v1111_v21  ;;  %v117_v17 = vadd.s32 776, %v1541_v4  ;;  %vm246_vm2 = vcmp.eq.s32.totalorder %v116_v14, %v1550_v9 }
 0x125   :  { %v1237_v25 = vadd.f32 %v1236_v22, %v1112_v24  ;;  %v820_v26 = vpop.permute.xlu1 %819  ;;  %v815_v27 = vpop.permute.xlu0 %814  ;;  %v118_v22 = vadd.s32 784, %v1541_v4  ;;  %vm247_vm3 = vcmp.eq.s32.totalorder %v117_v17, %v1550_v9 }
 0x126   :  { %v1114_v32 = vsel %vm232_vm4, %v815_v27, 0.0  ;;  %v1115_v37 = vsel %vm233_vm5, %v820_v26, 0.0 }
 0x127   :  { %v1238_v30 = vadd.f32 %v1237_v25, %v1113_v29  ;;  %v119_v25 = vadd.s32 792, %v1541_v4  ;;  %vm248_vm4 = vcmp.eq.s32.totalorder %v118_v22, %v1550_v9 }
 0x129   :  { %v1239_v33 = vadd.f32 %v1238_v30, %v1114_v32  ;;  %v830_v34 = vpop.permute.xlu1 %829  ;;  %v825_v35 = vpop.permute.xlu0 %824  ;;  %v120_v30 = vadd.s32 800, %v1541_v4  ;;  %vm249_vm5 = vcmp.eq.s32.totalorder %v119_v25, %v1550_v9 }
 0x12a   :  { %v1116_v40 = vsel %vm234_vm6, %v825_v35, 0.0  ;;  %v1117_v45 = vsel %vm235_vm7, %v830_v34, 0.0 }
 0x12b   :  { %v1240_v38 = vadd.f32 %v1239_v33, %v1115_v37  ;;  %v121_v33 = vadd.s32 808, %v1541_v4  ;;  %vm250_vm6 = vcmp.eq.s32.totalorder %v120_v30, %v1550_v9 }
 0x12d   :  { %v1241_v41 = vadd.f32 %v1240_v38, %v1116_v40  ;;  %v840_v42 = vpop.permute.xlu1 %839  ;;  %v835_v43 = vpop.permute.xlu0 %834  ;;  %v122_v38 = vadd.s32 816, %v1541_v4  ;;  %vm251_vm7 = vcmp.eq.s32.totalorder %v121_v33, %v1550_v9 }
 0x12e   :  { %v1118_v48 = vsel %vm236_vm8, %v835_v43, 0.0  ;;  %v1119_v53 = vsel %vm237_vm9, %v840_v42, 0.0 }
 0x12f   :  { %v1242_v46 = vadd.f32 %v1241_v41, %v1117_v45  ;;  %v123_v41 = vadd.s32 824, %v1541_v4  ;;  %vm252_vm8 = vcmp.eq.s32.totalorder %v122_v38, %v1550_v9 }
 0x131   :  { %v1243_v49 = vadd.f32 %v1242_v46, %v1118_v48  ;;  %v850_v50 = vpop.permute.xlu1 %849  ;;  %v845_v51 = vpop.permute.xlu0 %844  ;;  %v124_v46 = vadd.s32 832, %v1541_v4  ;;  %vm253_vm9 = vcmp.eq.s32.totalorder %v123_v41, %v1550_v9 }
 0x132   :  { %v1120_v56 = vsel %vm238_vm10, %v845_v51, 0.0  ;;  %v1121_v61 = vsel %vm239_vm11, %v850_v50, 0.0 }
 0x133   :  { %v1244_v54 = vadd.f32 %v1243_v49, %v1119_v53  ;;  %v125_v49 = vadd.s32 840, %v1541_v4  ;;  %vm254_vm10 = vcmp.eq.s32.totalorder %v124_v46, %v1550_v9 }
 0x135   :  { %v1245_v57 = vadd.f32 %v1244_v54, %v1120_v56  ;;  %v860_v58 = vpop.permute.xlu1 %859  ;;  %v855_v59 = vpop.permute.xlu0 %854  ;;  %v126_v54 = vadd.s32 848, %v1541_v4  ;;  %vm255_vm11 = vcmp.eq.s32.totalorder %v125_v49, %v1550_v9 }
 0x136   :  { %v1122_v0 = vsel %vm240_vm12, %v855_v59, 0.0  ;;  %v1123_v6 = vsel %vm241_vm13, %v860_v58, 0.0 }
 0x137   :  { %v1246_v62 = vadd.f32 %v1245_v57, %v1121_v61  ;;  %v127_v57 = vadd.s32 856, %v1541_v4  ;;  %vm256_vm12 = vcmp.eq.s32.totalorder %v126_v54, %v1550_v9 }
 0x139   :  { %v1247_v1 = vadd.f32 %v1246_v62, %v1122_v0  ;;  %v870_v2 = vpop.permute.xlu1 %869  ;;  %v865_v3 = vpop.permute.xlu0 %864  ;;  %v128_v62 = vadd.s32 864, %v1541_v4  ;;  %vm257_vm13 = vcmp.eq.s32.totalorder %v127_v57, %v1550_v9 }
 0x13a   :  { %v1124_v10 = vsel %vm242_vm14, %v865_v3, 0.0  ;;  %v1125_v15 = vsel %vm243_vm15, %v870_v2, 0.0 }
 0x13b   :  { %v1248_v7 = vadd.f32 %v1247_v1, %v1123_v6  ;;  %v129_v1 = vadd.s32 872, %v1541_v4  ;;  %vm258_vm14 = vcmp.eq.s32.totalorder %v128_v62, %v1550_v9 }
 0x13d   :  { %v1249_v11 = vadd.f32 %v1248_v7, %v1124_v10  ;;  %v880_v12 = vpop.permute.xlu1 %879  ;;  %v875_v13 = vpop.permute.xlu0 %874  ;;  %v130_v7 = vadd.s32 880, %v1541_v4  ;;  %vm259_vm15 = vcmp.eq.s32.totalorder %v129_v1, %v1550_v9 }
 0x13e   :  { %v1126_v18 = vsel %vm244_vm0, %v875_v13, 0.0  ;;  %v1127_v23 = vsel %vm245_vm1, %v880_v12, 0.0 }
 0x13f   :  { %v1250_v16 = vadd.f32 %v1249_v11, %v1125_v15  ;;  %v131_v11 = vadd.s32 888, %v1541_v4  ;;  %vm260_vm0 = vcmp.eq.s32.totalorder %v130_v7, %v1550_v9 }
 0x141   :  { %v1251_v19 = vadd.f32 %v1250_v16, %v1126_v18  ;;  %v890_v20 = vpop.permute.xlu1 %889  ;;  %v885_v21 = vpop.permute.xlu0 %884  ;;  %v132_v16 = vadd.s32 896, %v1541_v4  ;;  %vm261_vm1 = vcmp.eq.s32.totalorder %v131_v11, %v1550_v9 }
 0x142   :  { %v1128_v26 = vsel %vm246_vm2, %v885_v21, 0.0  ;;  %v1129_v31 = vsel %vm247_vm3, %v890_v20, 0.0 }
 0x143   :  { %v1252_v24 = vadd.f32 %v1251_v19, %v1127_v23  ;;  %v133_v19 = vadd.s32 904, %v1541_v4  ;;  %vm262_vm2 = vcmp.eq.s32.totalorder %v132_v16, %v1550_v9 }
 0x145   :  { %v1253_v27 = vadd.f32 %v1252_v24, %v1128_v26  ;;  %v900_v28 = vpop.permute.xlu1 %899  ;;  %v895_v29 = vpop.permute.xlu0 %894  ;;  %v134_v24 = vadd.s32 912, %v1541_v4  ;;  %vm263_vm3 = vcmp.eq.s32.totalorder %v133_v19, %v1550_v9 }
 0x146   :  { %v1130_v34 = vsel %vm248_vm4, %v895_v29, 0.0  ;;  %v1131_v39 = vsel %vm249_vm5, %v900_v28, 0.0 }
 0x147   :  { %v1254_v32 = vadd.f32 %v1253_v27, %v1129_v31  ;;  %v135_v27 = vadd.s32 920, %v1541_v4  ;;  %vm264_vm4 = vcmp.eq.s32.totalorder %v134_v24, %v1550_v9 }
 0x149   :  { %v1255_v35 = vadd.f32 %v1254_v32, %v1130_v34  ;;  %v910_v36 = vpop.permute.xlu1 %909  ;;  %v905_v37 = vpop.permute.xlu0 %904  ;;  %v136_v32 = vadd.s32 928, %v1541_v4  ;;  %vm265_vm5 = vcmp.eq.s32.totalorder %v135_v27, %v1550_v9 }
 0x14a   :  { %v1132_v42 = vsel %vm250_vm6, %v905_v37, 0.0  ;;  %v1133_v47 = vsel %vm251_vm7, %v910_v36, 0.0 }
 0x14b   :  { %v1256_v40 = vadd.f32 %v1255_v35, %v1131_v39  ;;  %v137_v35 = vadd.s32 936, %v1541_v4  ;;  %vm266_vm6 = vcmp.eq.s32.totalorder %v136_v32, %v1550_v9 }
 0x14d   :  { %v1257_v43 = vadd.f32 %v1256_v40, %v1132_v42  ;;  %v920_v44 = vpop.permute.xlu1 %919  ;;  %v915_v45 = vpop.permute.xlu0 %914  ;;  %v138_v40 = vadd.s32 944, %v1541_v4  ;;  %vm267_vm7 = vcmp.eq.s32.totalorder %v137_v35, %v1550_v9 }
 0x14e   :  { %v1134_v50 = vsel %vm252_vm8, %v915_v45, 0.0  ;;  %v1135_v55 = vsel %vm253_vm9, %v920_v44, 0.0 }
 0x14f   :  { %v1258_v48 = vadd.f32 %v1257_v43, %v1133_v47  ;;  %v139_v43 = vadd.s32 952, %v1541_v4  ;;  %vm268_vm8 = vcmp.eq.s32.totalorder %v138_v40, %v1550_v9 }
 0x151   :  { %v1259_v51 = vadd.f32 %v1258_v48, %v1134_v50  ;;  %v930_v52 = vpop.permute.xlu1 %929  ;;  %v925_v53 = vpop.permute.xlu0 %924  ;;  %v140_v48 = vadd.s32 960, %v1541_v4  ;;  %vm269_vm9 = vcmp.eq.s32.totalorder %v139_v43, %v1550_v9 }
 0x152   :  { %v1136_v58 = vsel %vm254_vm10, %v925_v53, 0.0  ;;  %v1137_v63 = vsel %vm255_vm11, %v930_v52, 0.0 }
 0x153   :  { %v1260_v56 = vadd.f32 %v1259_v51, %v1135_v55  ;;  %v141_v51 = vadd.s32 968, %v1541_v4  ;;  %vm270_vm10 = vcmp.eq.s32.totalorder %v140_v48, %v1550_v9 }
 0x155   :  { %v1261_v59 = vadd.f32 %v1260_v56, %v1136_v58  ;;  %v940_v60 = vpop.permute.xlu1 %939  ;;  %v935_v61 = vpop.permute.xlu0 %934  ;;  %v142_v56 = vadd.s32 976, %v1541_v4  ;;  %vm271_vm11 = vcmp.eq.s32.totalorder %v141_v51, %v1550_v9 }
 0x156   :  { %v1138_v2 = vsel %vm256_vm12, %v935_v61, 0.0  ;;  %v1139_v8 = vsel %vm257_vm13, %v940_v60, 0.0 }
 0x157   :  { %v1262_v0 = vadd.f32 %v1261_v59, %v1137_v63  ;;  %v143_v59 = vadd.s32 984, %v1541_v4  ;;  %vm272_vm12 = vcmp.eq.s32.totalorder %v142_v56, %v1550_v9 }
 0x159   :  { %v1263_v3 = vadd.f32 %v1262_v0, %v1138_v2  ;;  %v950_v5 = vpop.permute.xlu1 %949  ;;  %v945_v6 = vpop.permute.xlu0 %944  ;;  %v144_v0 = vadd.s32 992, %v1541_v4  ;;  %vm273_vm13 = vcmp.eq.s32.totalorder %v143_v59, %v1550_v9 }
 0x15a   :  { %v1140_v12 = vsel %vm258_vm14, %v945_v6, 0.0  ;;  %v1141_v17 = vsel %vm259_vm15, %v950_v5, 0.0 }
 0x15b   :  { %v1264_v10 = vadd.f32 %v1263_v3, %v1139_v8  ;;  %v145_v3 = vadd.s32 1000, %v1541_v4  ;;  %vm274_vm14 = vcmp.eq.s32.totalorder %v144_v0, %v1550_v9 }
 0x15d   :  { %v1265_v13 = vadd.f32 %v1264_v10, %v1140_v12  ;;  %v960_v14 = vpop.permute.xlu1 %959  ;;  %v955_v15 = vpop.permute.xlu0 %954  ;;  %vm275_vm15 = vcmp.eq.s32.totalorder %v145_v3, %v1550_v9 }
 0x15e   :  { %v1142_v20 = vsel %vm260_vm0, %v955_v15, 0.0  ;;  %v1143_v25 = vsel %vm261_vm1, %v960_v14, 0.0 }
 0x15f   :  { %v1266_v18 = vadd.f32 %v1265_v13, %v1141_v17 }
 0x161   :  { %v1267_v21 = vadd.f32 %v1266_v18, %v1142_v20  ;;  %v970_v22 = vpop.permute.xlu1 %969  ;;  %v965_v23 = vpop.permute.xlu0 %964 }
 0x162   :  { %v1144_v28 = vsel %vm262_vm2, %v965_v23, 0.0  ;;  %v1145_v33 = vsel %vm263_vm3, %v970_v22, 0.0 }
 0x163   :  { %v1268_v26 = vadd.f32 %v1267_v21, %v1143_v25 }
 0x165   :  { %v1269_v29 = vadd.f32 %v1268_v26, %v1144_v28  ;;  %v980_v30 = vpop.permute.xlu1 %979  ;;  %v975_v31 = vpop.permute.xlu0 %974 }
 0x166   :  { %v1146_v36 = vsel %vm264_vm4, %v975_v31, 0.0  ;;  %v1147_v41 = vsel %vm265_vm5, %v980_v30, 0.0 }
 0x167   :  { %v1270_v34 = vadd.f32 %v1269_v29, %v1145_v33 }
 0x169   :  { %v1271_v37 = vadd.f32 %v1270_v34, %v1146_v36  ;;  %v990_v38 = vpop.permute.xlu1 %989  ;;  %v985_v39 = vpop.permute.xlu0 %984 }
 0x16a   :  { %v1148_v44 = vsel %vm266_vm6, %v985_v39, 0.0  ;;  %v1149_v49 = vsel %vm267_vm7, %v990_v38, 0.0 }
 0x16b   :  { %v1272_v42 = vadd.f32 %v1271_v37, %v1147_v41 }
 0x16d   :  { %v1273_v45 = vadd.f32 %v1272_v42, %v1148_v44  ;;  %v1000_v46 = vpop.permute.xlu1 %999  ;;  %v995_v47 = vpop.permute.xlu0 %994 }
 0x16e   :  { %v1150_v52 = vsel %vm268_vm8, %v995_v47, 0.0  ;;  %v1151_v57 = vsel %vm269_vm9, %v1000_v46, 0.0 }
 0x16f   :  { %v1274_v50 = vadd.f32 %v1273_v45, %v1149_v49 }
 0x171   :  { %v1275_v53 = vadd.f32 %v1274_v50, %v1150_v52  ;;  %v1010_v54 = vpop.permute.xlu1 %1009  ;;  %v1005_v55 = vpop.permute.xlu0 %1004 }
 0x172   :  { %v1152_v60 = vsel %vm270_vm10, %v1005_v55, 0.0  ;;  %v1153_v1 = vsel %vm271_vm11, %v1010_v54, 0.0 }
 0x173   :  { %v1276_v58 = vadd.f32 %v1275_v53, %v1151_v57 }
 0x175   :  { %v1277_v61 = vadd.f32 %v1276_v58, %v1152_v60  ;;  %v1020_v62 = vpop.permute.xlu1 %1019  ;;  %v1015_v63 = vpop.permute.xlu0 %1014 }
 0x176   :  { %v1154_v5 = vsel %vm272_vm12, %v1015_v63, 0.0  ;;  %v1155_v8 = vsel %vm273_vm13, %v1020_v62, 0.0 }
 0x177   :  { %v1278_v2 = vadd.f32 %v1277_v61, %v1153_v1 }
 0x179   :  { %v1279_v6 = vadd.f32 %v1278_v2, %v1154_v5  ;;  %v1025_v7 = vpop.permute.xlu0 %1024  ;;  %v1030_v10 = vpop.permute.xlu1 %1029 }
 0x17a   :  { %v1156_v12 = vsel %vm274_vm14, %v1025_v7, 0.0  ;;  %v1157_v14 = vsel %vm275_vm15, %v1030_v10, 0.0 }
 0x17b   :  { %v1280_v11 = vadd.f32 %v1279_v6, %v1155_v8 }
 0x17d   :  { %v1281_v13 = vadd.f32 %v1280_v11, %v1156_v12 }
 0x17f   :  { %v1282_v15 = vadd.f32 %v1281_v13, %v1157_v14 }
 0x181   :  { %v1283_v16 = vrot.slane %v1282_v15, 4 }
 0x183   :  { %v1284_v17 = vadd.f32 %v1283_v16, %v1282_v15 }
 0x185   :  { %v1285_v18 = vrot.slane %v1284_v17, 2 }
 0x187   :  { %v1286_v19 = vadd.f32 %v1285_v18, %v1284_v17 }
 0x189   :  { %v1287_v4 = vrot.slane %v1286_v19, 1 }
 0x18b   :  { %v1288_v20 = vadd.f32 %v1287_v4, %v1286_v19 }
 0x18d   :  { %1289 = vst [vmem:[#allocation2] sm:$0x1] %v1288_v20 }
 0x18e   :  { %1322 = shalt.err (!%p1319_p4)
}
 0x18f   :  { %s1323_s11 = scalar_lea.hbm %s2004_s2, 16 }
 0x190   :  { %p1324_p5 = scmp.ne.s32.totalorder %s2004_s2, %s1323_s11  ;;  %p1327_p6 = scmp.lt.u32.totalorder %s1323_s11, %s2004_s2 }
 0x192   :  { %p1329_p7 = pnand %p1327_p6, %p1324_p5 }
 0x194   :  { %1332 = shalt.err (!%p1329_p7)
}
 0x195   :  { %1299 = dma.vmem_to_hbm [thread:$0]  %s1297_s6, 16, %s2004_s2, [#allocation3]  }
 0x196   :  { %1333 = dma.done.wait [#allocation3], 16  }
 0x197   :  { %1334 = vsyncadd [#allocation3], 4294967280 }
 0x198   :  { %1303 = vsyncpa [#allocation3], 1 }

</bundles_post_ra>
